<compile_context>
chip_gen: v7x
topology: tpu7x:2x2x1
jax: 0.10.0
libtpu: 0.0.40
codegen_flags: <defaults>
</compile_context>

<pallas_src>
import jax
import jax.numpy as jnp
from jax.experimental import pallas as pl
from jax.experimental.pallas import tpu as pltpu  # noqa: F401  (TPU backend assumed)

# ---------------- config (small, consistent with the module) ----------------
N, C_IN, H, W = 2, 4, 16, 16          # batch['input'] : (2, 4, 16, 16) NCHW
HID = 32                              # hidden channels of the backbone conv
NCLS = 4                              # heatmap classes
NHEAD = NCLS + 2                      # fused hm|wh head width
WH_WEIGHT = 0.1                       # opt.wh_weight
HW = H * W                            # 256 -> lane axis (multiple of 128)
K1 = C_IN * 9                         # im2col feature size


# ---------------------------- Pallas kernel ---------------------------------
def _fused_model_loss_kernel(
    x_ref,      # (N, K1, HW)    im2col patches, transposed layout (features on sublanes)
    w1_ref,     # (HID, K1)      backbone 3x3 conv weight (transposed)
    b1_ref,     # (HID, 1)
    wh_ref,     # (NHEAD, HID)   fused hm|wh 1x1 head weight (transposed)
    bh_ref,     # (NHEAD, 1)
    gt_ref,     # (N, NHEAD, HW) fused ground truth: gt_hm | gt_wh
    out_ref,    # (N, NHEAD, HW) fused predictions:  hm | wh
    loss_ref,   # (1, 8)         [total, hm_loss, wh_loss, num_pos, 0, 0, 0, 0]
):
    pos_loss = 0.0
    neg_loss = 0.0
    num_pos = 0.0
    wh_abs = 0.0
    mask_sum = 0.0

    for n in range(N):  # static unrolled loop, N == 2
        # ---- model forward: two lane-dense MXU matmuls per image ----
        xn = x_ref[n]                                                          # (K1, HW)
        h = jnp.dot(w1_ref[...], xn, preferred_element_type=jnp.float32) + b1_ref[...]
        h = jnp.maximum(h, 0.0)                                                # ReLU (HID, HW)
        heads = jnp.dot(wh_ref[...], h, preferred_element_type=jnp.float32) + bh_ref[...]
        out_ref[n] = heads                                                     # (NHEAD, HW)

        hm = heads[:NCLS, :]                                                   # (NCLS, HW)
        wh = heads[NCLS:, :]                                                   # (2, HW)
        gt = gt_ref[n]                                                         # (NHEAD, HW)
        gt_hm = gt[:NCLS, :]
        gt_wh = gt[NCLS:, :]

        # ---- CenterNet focal loss on sigmoid(hm) ----
        pred = 0.5 * (jnp.tanh(0.5 * hm) + 1.0)          # stable sigmoid, single EUP tanh
        pred = jnp.clip(pred, 1e-4, 1.0 - 1e-4)
        pos = jnp.where(gt_hm >= 1.0, 1.0, 0.0)
        one_m = 1.0 - gt_hm
        neg_w = jnp.square(one_m) * jnp.square(one_m)    # (1 - gt)^4
        pos_loss += jnp.sum(jnp.log(pred) * jnp.square(1.0 - pred) * pos)
        neg_loss += jnp.sum(jnp.log(1.0 - pred) * jnp.square(pred) * neg_w * (1.0 - pos))
        num_pos += jnp.sum(pos)

        # ---- masked L1 on wh (mask = any positive class at that pixel) ----
        loc_mask = jnp.max(pos, axis=0, keepdims=True)                         # (1, HW)
        wh_abs += jnp.sum(jnp.abs(wh - gt_wh) * loc_mask)
        mask_sum += jnp.sum(loc_mask)

    hm_loss = jnp.where(
        num_pos > 0.0,
        -(pos_loss + neg_loss) / jnp.maximum(num_pos, 1.0),
        -neg_loss,
    )
    wh_loss = wh_abs / (mask_sum * 2.0 + 1e-4)
    total = hm_loss + WH_WEIGHT * wh_loss

    lane = jax.lax.broadcasted_iota(jnp.int32, (1, 8), 1)
    loss_ref[...] = (
        jnp.where(lane == 0, total, 0.0)
        + jnp.where(lane == 1, hm_loss, 0.0)
        + jnp.where(lane == 2, wh_loss, 0.0)
        + jnp.where(lane == 3, num_pos, 0.0)
    )


# ------------------------------- glue ----------------------------------------
def _im2col_3x3_nchw(x_nchw):
    """(N, C, H, W) -> (N, C*9, H*W); feature index = (ky*3+kx)*C + c. No transposes."""
    n, c, h, w = x_nchw.shape
    xp = jnp.pad(x_nchw, ((0, 0), (0, 0), (1, 1), (1, 1)))
    patches = [xp[:, :, dy:dy + h, dx:dx + w] for dy in range(3) for dx in range(3)]
    return jnp.stack(patches, axis=1).reshape(n, 9 * c, h * w)


@jax.jit
def model_with_loss_forward(x_nchw, params, gt_hm_nchw, gt_wh_nchw):
    """Mirrors ModelWithLoss.forward: returns (outputs, losses, loss_stats, losses_gn)."""
    w1, b1, whm, bhm, wwh, bwh = params
    n, _, h, w = x_nchw.shape
    hw = h * w

    # Weight prep (tiny): transpose for the channels-on-sublanes dataflow and fuse heads.
    w1t = w1.T                                              # (HID, K1)
    b1t = b1.reshape(HID, 1)
    wht = jnp.concatenate([whm, wwh], axis=1).T             # (NHEAD, HID)
    bht = jnp.concatenate([bhm, bwh], axis=1).reshape(NHEAD, 1)

    x_cols = _im2col_3x3_nchw(x_nchw)                       # (N, K1, HW)
    gt = jnp.concatenate(
        [gt_hm_nchw.reshape(n, NCLS, hw), gt_wh_nchw.reshape(n, 2, hw)], axis=1
    )                                                       # (N, NHEAD, HW)

    # Single kernel invocation, everything resident in VMEM (no grid, no accumulator).
    out, loss_vec = pl.pallas_call(
        _fused_model_loss_kernel,
        out_shape=(
            jax.ShapeDtypeStruct((n, NHEAD, hw), jnp.float32),
            jax.ShapeDtypeStruct((1, 8), jnp.float32),
        ),
    )(x_cols, w1t, b1t, wht, bht, gt)

    # Outputs are already NCHW-ordered: just slice + reshape (no transposes).
    hm = out[:, :NCLS, :].reshape(n, NCLS, h, w)
    wh = out[:, NCLS:, :].reshape(n, 2, h, w)

    total, hm_loss, wh_loss = loss_vec[0, 0], loss_vec[0, 1], loss_vec[0, 2]
    outputs = {"hm": hm, "wh": wh}
    losses = total
    loss_stats = {"loss": total, "hm_loss": hm_loss, "wh_loss": wh_loss}
    losses_gn = jnp.stack([hm_loss, wh_loss])               # per-task losses (GradNorm)
    return outputs, losses, loss_stats, losses_gn


# ------------------------- pure-JAX reference (for checking) -----------------
def _im2col_3x3_nhwc(x_nhwc):
    n, h, w, c = x_nhwc.shape
    xp = jnp.pad(x_nhwc, ((0, 0), (1, 1), (1, 1), (0, 0)))
    patches = [xp[:, dy:dy + h, dx:dx + w, :] for dy in range(3) for dx in range(3)]
    return jnp.concatenate(patches, axis=-1).reshape(n * h * w, c * 9)


def _reference(x_nchw, params, gt_hm_nchw, gt_wh_nchw):
    w1, b1, whm, bhm, wwh, bwh = params
    n, _, h, w = x_nchw.shape
    m = n * h * w
    x_cols = _im2col_3x3_nhwc(jnp.transpose(x_nchw, (0, 2, 3, 1)))
    gt_hm = jnp.transpose(gt_hm_nchw, (0, 2, 3, 1)).reshape(m, NCLS)
    gt_wh = jnp.transpose(gt_wh_nchw, (0, 2, 3, 1)).reshape(m, 2)
    hdn = jnp.maximum(x_cols @ w1 + b1, 0.0)
    hm = hdn @ whm + bhm
    wh = hdn @ wwh + bwh
    pred = jnp.clip(jax.nn.sigmoid(hm), 1e-4, 1 - 1e-4)
    pos = (gt_hm >= 1.0).astype(jnp.float32)
    neg_w = (1.0 - gt_hm) ** 4
    pos_loss = jnp.sum(jnp.log(pred) * (1 - pred) ** 2 * pos)
    neg_loss = jnp.sum(jnp.log(1 - pred) * pred ** 2 * neg_w * (1 - pos))
    npos = jnp.sum(pos)
    hm_loss = jnp.where(npos > 0, -(pos_loss + neg_loss) / jnp.maximum(npos, 1.0), -neg_loss)
    loc_mask = jnp.max(pos, axis=-1, keepdims=True)
    wh_loss = jnp.sum(jnp.abs(wh - gt_wh) * loc_mask) / (jnp.sum(loc_mask) * 2.0 + 1e-4)
    return hm, wh, hm_loss + WH_WEIGHT * wh_loss, hm_loss, wh_loss


# --------------------------------- main ---------------------------------------
if __name__ == "__main__":
    key = jax.random.PRNGKey(0)
    ks = jax.random.split(key, 8)

    # deterministic synthetic parameters (shapes implied by the model heads)
    w1 = jax.random.normal(ks[0], (C_IN * 9, HID), jnp.float32) * 0.1
    b1 = jnp.zeros((1, HID), jnp.float32)
    whm = jax.random.normal(ks[1], (HID, NCLS), jnp.float32) * 0.1
    bhm = jnp.full((1, NCLS), -2.19, jnp.float32)          # CenterNet hm bias prior
    wwh = jax.random.normal(ks[2], (HID, 2), jnp.float32) * 0.1
    bwh = jnp.zeros((1, 2), jnp.float32)
    params = (w1, b1, whm, bhm, wwh, bwh)

    # synthetic "batch": input, gt heatmap (with exact-1.0 peaks), gt wh
    x = jax.random.normal(ks[3], (N, C_IN, H, W), jnp.float32)
    gt_hm = jax.random.uniform(ks[4], (N, NCLS, H, W), jnp.float32) * 0.8
    peak = jax.random.uniform(ks[5], (N, NCLS, H, W), jnp.float32) > 0.98
    gt_hm = jnp.where(peak, 1.0, gt_hm)
    gt_wh = jax.random.uniform(ks[6], (N, 2, H, W), jnp.float32) * 4.0

    outputs, losses, loss_stats, losses_gn = model_with_loss_forward(x, params, gt_hm, gt_wh)
    jax.block_until_ready((outputs, losses, loss_stats, losses_gn))

    # sanity check against pure-JAX reference
    hm_r, wh_r, tot_r, hm_l_r, wh_l_r = _reference(x, params, gt_hm, gt_wh)
    hm_r = jnp.transpose(hm_r.reshape(N, H, W, NCLS), (0, 3, 1, 2))
    wh_r = jnp.transpose(wh_r.reshape(N, H, W, 2), (0, 3, 1, 2))
    assert jnp.allclose(outputs["hm"], hm_r, rtol=2e-3, atol=2e-3)
    assert jnp.allclose(outputs["wh"], wh_r, rtol=2e-3, atol=2e-3)
    assert jnp.allclose(losses, tot_r, rtol=2e-3, atol=2e-3)
    assert jnp.allclose(loss_stats["hm_loss"], hm_l_r, rtol=2e-3, atol=2e-3)
    assert jnp.allclose(loss_stats["wh_loss"], wh_l_r, rtol=2e-3, atol=2e-3)
    assert jnp.allclose(losses_gn, jnp.stack([hm_l_r, wh_l_r]), rtol=2e-3, atol=2e-3)

    print("KERNEL_OK")
</pallas_src>

<mosaic_0001>
module attributes {stable_mosaic.version = 11 : i64} {
  func.func @_fused_model_loss_kernel(%arg0: memref<2x36x256xf32, #tpu.memory_space<vmem>>, %arg1: memref<32x36xf32, #tpu.memory_space<vmem>>, %arg2: memref<32x1xf32, #tpu.memory_space<vmem>>, %arg3: memref<6x32xf32, #tpu.memory_space<vmem>>, %arg4: memref<6x1xf32, #tpu.memory_space<vmem>>, %arg5: memref<2x6x256xf32, #tpu.memory_space<vmem>>, %arg6: memref<2x6x256xf32, #tpu.memory_space<vmem>>, %arg7: memref<1x8xf32, #tpu.memory_space<vmem>>) attributes {dimension_semantics = [], scalar_prefetch = 0 : i64, scratch_operands = 0 : i64, tpu.core_type = #tpu.core_type<tc>} {
    %c0 = arith.constant 0 : index
    %c0_0 = arith.constant 0 : index
    %c0_1 = arith.constant 0 : index
    %0 = vector.load %arg0[%c0, %c0_0, %c0_1] : memref<2x36x256xf32, #tpu.memory_space<vmem>>, vector<1x36x256xf32>
    %1 = vector.shape_cast %0 : vector<1x36x256xf32> to vector<36x256xf32>
    %c0_2 = arith.constant 0 : index
    %c0_3 = arith.constant 0 : index
    %2 = vector.load %arg1[%c0_2, %c0_3] : memref<32x36xf32, #tpu.memory_space<vmem>>, vector<32x36xf32>
    %cst = arith.constant dense<0.000000e+00> : vector<32x256xf32>
    %3 = tpu.matmul %2, %1, %cst {dimension_numbers = #tpu.dot_dimension_numbers<[1], [0], [0], [1], [0, 0, 1, 1], [], []>} : vector<32x36xf32>, vector<36x256xf32>, vector<32x256xf32> -> vector<32x256xf32>
    %c0_4 = arith.constant 0 : index
    %c0_5 = arith.constant 0 : index
    %4 = vector.load %arg2[%c0_4, %c0_5] : memref<32x1xf32, #tpu.memory_space<vmem>>, vector<32x1xf32>
    %5 = vector.broadcast %4 : vector<32x1xf32> to vector<32x256xf32>
    %6 = arith.addf %3, %5 : vector<32x256xf32>
    %cst_6 = arith.constant 0.000000e+00 : f32
    %7 = vector.broadcast %cst_6 : f32 to vector<32x256xf32>
    %8 = arith.maximumf %6, %7 : vector<32x256xf32>
    %c0_7 = arith.constant 0 : index
    %c0_8 = arith.constant 0 : index
    %9 = vector.load %arg3[%c0_7, %c0_8] : memref<6x32xf32, #tpu.memory_space<vmem>>, vector<6x32xf32>
    %cst_9 = arith.constant dense<0.000000e+00> : vector<6x256xf32>
    %10 = tpu.matmul %9, %8, %cst_9 {dimension_numbers = #tpu.dot_dimension_numbers<[1], [0], [0], [1], [0, 0, 1, 1], [], []>} : vector<6x32xf32>, vector<32x256xf32>, vector<6x256xf32> -> vector<6x256xf32>
    %c0_10 = arith.constant 0 : index
    %c0_11 = arith.constant 0 : index
    %11 = vector.load %arg4[%c0_10, %c0_11] : memref<6x1xf32, #tpu.memory_space<vmem>>, vector<6x1xf32>
    %12 = vector.broadcast %11 : vector<6x1xf32> to vector<6x256xf32>
    %13 = arith.addf %10, %12 : vector<6x256xf32>
    %c0_12 = arith.constant 0 : index
    %c0_13 = arith.constant 0 : index
    %c0_14 = arith.constant 0 : index
    %14 = vector.load %arg6[%c0_12, %c0_13, %c0_14] : memref<2x6x256xf32, #tpu.memory_space<vmem>>, vector<1x6x256xf32>
    %15 = vector.shape_cast %14 : vector<1x6x256xf32> to vector<6x256xf32>
    %16 = vector.shape_cast %13 : vector<6x256xf32> to vector<1x6x256xf32>
    tpu.vector_store %arg6[%c0_12, %c0_13, %c0_14], %16 {strides = array<i32>} : memref<2x6x256xf32, #tpu.memory_space<vmem>>, vector<1x6x256xf32>,
    %17 = vector.extract_strided_slice %13 {offsets = [0, 0], sizes = [4, 256], strides = [1, 1]} : vector<6x256xf32> to vector<4x256xf32>
    %18 = vector.extract_strided_slice %13 {offsets = [4, 0], sizes = [2, 256], strides = [1, 1]} : vector<6x256xf32> to vector<2x256xf32>
    %c0_15 = arith.constant 0 : index
    %c0_16 = arith.constant 0 : index
    %c0_17 = arith.constant 0 : index
    %19 = vector.load %arg5[%c0_15, %c0_16, %c0_17] : memref<2x6x256xf32, #tpu.memory_space<vmem>>, vector<1x6x256xf32>
    %20 = vector.shape_cast %19 : vector<1x6x256xf32> to vector<6x256xf32>
    %21 = vector.extract_strided_slice %20 {offsets = [0, 0], sizes = [4, 256], strides = [1, 1]} : vector<6x256xf32> to vector<4x256xf32>
    %22 = vector.extract_strided_slice %20 {offsets = [4, 0], sizes = [2, 256], strides = [1, 1]} : vector<6x256xf32> to vector<2x256xf32>
    %cst_18 = arith.constant 5.000000e-01 : f32
    %23 = vector.broadcast %cst_18 : f32 to vector<4x256xf32>
    %24 = arith.mulf %23, %17 : vector<4x256xf32>
    %25 = math.tanh %24 : vector<4x256xf32>
    %cst_19 = arith.constant 1.000000e+00 : f32
    %26 = vector.broadcast %cst_19 : f32 to vector<4x256xf32>
    %27 = arith.addf %25, %26 : vector<4x256xf32>
    %cst_20 = arith.constant 5.000000e-01 : f32
    %28 = vector.broadcast %cst_20 : f32 to vector<4x256xf32>
    %29 = arith.mulf %28, %27 : vector<4x256xf32>
    %cst_21 = arith.constant 9.99999974E-5 : f32
    %cst_22 = arith.constant 0.999899983 : f32
    %30 = vector.broadcast %cst_21 : f32 to vector<4x256xf32>
    %31 = arith.maximumf %30, %29 : vector<4x256xf32>
    %32 = vector.broadcast %cst_22 : f32 to vector<4x256xf32>
    %33 = arith.minimumf %32, %31 : vector<4x256xf32>
    %cst_23 = arith.constant 1.000000e+00 : f32
    %34 = vector.broadcast %cst_23 : f32 to vector<4x256xf32>
    %35 = arith.cmpf oge, %21, %34 : vector<4x256xf32>
    %cst_24 = arith.constant 1.000000e+00 : f32
    %cst_25 = arith.constant 0.000000e+00 : f32
    %36 = vector.broadcast %cst_24 : f32 to vector<4x256xf32>
    %37 = vector.broadcast %cst_25 : f32 to vector<4x256xf32>
    %38 = arith.select %35, %36, %37 : vector<4x256xi1>, vector<4x256xf32>
    %cst_26 = arith.constant 1.000000e+00 : f32
    %39 = vector.broadcast %cst_26 : f32 to vector<4x256xf32>
    %40 = arith.subf %39, %21 : vector<4x256xf32>
    %41 = arith.mulf %40, %40 : vector<4x256xf32>
    %42 = arith.mulf %40, %40 : vector<4x256xf32>
    %43 = arith.mulf %41, %42 : vector<4x256xf32>
    %44 = math.log %33 : vector<4x256xf32>
    %cst_27 = arith.constant 1.000000e+00 : f32
    %45 = vector.broadcast %cst_27 : f32 to vector<4x256xf32>
    %46 = arith.subf %45, %33 : vector<4x256xf32>
    %47 = arith.mulf %46, %46 : vector<4x256xf32>
    %48 = arith.mulf %44, %47 : vector<4x256xf32>
    %49 = arith.mulf %48, %38 : vector<4x256xf32>
    %50 = vector.shape_cast %49 : vector<4x256xf32> to vector<1x4x256xf32>
    %cst_28 = arith.constant dense<0.000000e+00> : vector<1xf32>
    %51 = vector.multi_reduction <add>, %50, %cst_28 [1, 2] : vector<1x4x256xf32> to vector<1xf32>
    %52 = vector.shape_cast %51 : vector<1xf32> to vector<1x1x1xf32>
    %53 = vector.extract %52[0, 0, 0] : f32 from vector<1x1x1xf32>
    %cst_29 = arith.constant 0.000000e+00 : f32
    %54 = arith.addf %cst_29, %53 : f32
    %cst_30 = arith.constant 1.000000e+00 : f32
    %55 = vector.broadcast %cst_30 : f32 to vector<4x256xf32>
    %56 = arith.subf %55, %33 : vector<4x256xf32>
    %57 = math.log %56 : vector<4x256xf32>
    %58 = arith.mulf %33, %33 : vector<4x256xf32>
    %59 = arith.mulf %57, %58 : vector<4x256xf32>
    %60 = arith.mulf %59, %43 : vector<4x256xf32>
    %cst_31 = arith.constant 1.000000e+00 : f32
    %61 = vector.broadcast %cst_31 : f32 to vector<4x256xf32>
    %62 = arith.subf %61, %38 : vector<4x256xf32>
    %63 = arith.mulf %60, %62 : vector<4x256xf32>
    %64 = vector.shape_cast %63 : vector<4x256xf32> to vector<1x4x256xf32>
    %cst_32 = arith.constant dense<0.000000e+00> : vector<1xf32>
    %65 = vector.multi_reduction <add>, %64, %cst_32 [1, 2] : vector<1x4x256xf32> to vector<1xf32>
    %66 = vector.shape_cast %65 : vector<1xf32> to vector<1x1x1xf32>
    %67 = vector.extract %66[0, 0, 0] : f32 from vector<1x1x1xf32>
    %cst_33 = arith.constant 0.000000e+00 : f32
    %68 = arith.addf %cst_33, %67 : f32
    %69 = vector.shape_cast %38 : vector<4x256xf32> to vector<1x4x256xf32>
    %cst_34 = arith.constant dense<0.000000e+00> : vector<1xf32>
    %70 = vector.multi_reduction <add>, %69, %cst_34 [1, 2] : vector<1x4x256xf32> to vector<1xf32>
    %71 = vector.shape_cast %70 : vector<1xf32> to vector<1x1x1xf32>
    %72 = vector.extract %71[0, 0, 0] : f32 from vector<1x1x1xf32>
    %cst_35 = arith.constant 0.000000e+00 : f32
    %73 = arith.addf %cst_35, %72 : f32
    %cst_36 = arith.constant dense<0xFF800000> : vector<256xf32>
    %74 = vector.multi_reduction <maximumf>, %38, %cst_36 [0] : vector<4x256xf32> to vector<256xf32>
    %75 = vector.shape_cast %74 : vector<256xf32> to vector<1x256xf32>
    %76 = arith.subf %18, %22 : vector<2x256xf32>
    %77 = math.absf %76 : vector<2x256xf32>
    %78 = vector.broadcast %75 : vector<1x256xf32> to vector<2x256xf32>
    %79 = arith.mulf %77, %78 : vector<2x256xf32>
    %80 = vector.shape_cast %79 : vector<2x256xf32> to vector<1x2x256xf32>
    %cst_37 = arith.constant dense<0.000000e+00> : vector<1xf32>
    %81 = vector.multi_reduction <add>, %80, %cst_37 [1, 2] : vector<1x2x256xf32> to vector<1xf32>
    %82 = vector.shape_cast %81 : vector<1xf32> to vector<1x1x1xf32>
    %83 = vector.extract %82[0, 0, 0] : f32 from vector<1x1x1xf32>
    %cst_38 = arith.constant 0.000000e+00 : f32
    %84 = arith.addf %cst_38, %83 : f32
    %85 = vector.shape_cast %75 : vector<1x256xf32> to vector<1x1x256xf32>
    %cst_39 = arith.constant dense<0.000000e+00> : vector<1xf32>
    %86 = vector.multi_reduction <add>, %85, %cst_39 [1, 2] : vector<1x1x256xf32> to vector<1xf32>
    %87 = vector.shape_cast %86 : vector<1xf32> to vector<1x1x1xf32>
    %88 = vector.extract %87[0, 0, 0] : f32 from vector<1x1x1xf32>
    %cst_40 = arith.constant 0.000000e+00 : f32
    %89 = arith.addf %cst_40, %88 : f32
    %c1 = arith.constant 1 : index
    %c0_41 = arith.constant 0 : index
    %c0_42 = arith.constant 0 : index
    %90 = vector.load %arg0[%c1, %c0_41, %c0_42] : memref<2x36x256xf32, #tpu.memory_space<vmem>>, vector<1x36x256xf32>
    %91 = vector.shape_cast %90 : vector<1x36x256xf32> to vector<36x256xf32>
    %c0_43 = arith.constant 0 : index
    %c0_44 = arith.constant 0 : index
    %92 = vector.load %arg1[%c0_43, %c0_44] : memref<32x36xf32, #tpu.memory_space<vmem>>, vector<32x36xf32>
    %cst_45 = arith.constant dense<0.000000e+00> : vector<32x256xf32>
    %93 = tpu.matmul %92, %91, %cst_45 {dimension_numbers = #tpu.dot_dimension_numbers<[1], [0], [0], [1], [0, 0, 1, 1], [], []>} : vector<32x36xf32>, vector<36x256xf32>, vector<32x256xf32> -> vector<32x256xf32>
    %c0_46 = arith.constant 0 : index
    %c0_47 = arith.constant 0 : index
    %94 = vector.load %arg2[%c0_46, %c0_47] : memref<32x1xf32, #tpu.memory_space<vmem>>, vector<32x1xf32>
    %95 = vector.broadcast %94 : vector<32x1xf32> to vector<32x256xf32>
    %96 = arith.addf %93, %95 : vector<32x256xf32>
    %cst_48 = arith.constant 0.000000e+00 : f32
    %97 = vector.broadcast %cst_48 : f32 to vector<32x256xf32>
    %98 = arith.maximumf %96, %97 : vector<32x256xf32>
    %c0_49 = arith.constant 0 : index
    %c0_50 = arith.constant 0 : index
    %99 = vector.load %arg3[%c0_49, %c0_50] : memref<6x32xf32, #tpu.memory_space<vmem>>, vector<6x32xf32>
    %cst_51 = arith.constant dense<0.000000e+00> : vector<6x256xf32>
    %100 = tpu.matmul %99, %98, %cst_51 {dimension_numbers = #tpu.dot_dimension_numbers<[1], [0], [0], [1], [0, 0, 1, 1], [], []>} : vector<6x32xf32>, vector<32x256xf32>, vector<6x256xf32> -> vector<6x256xf32>
    %c0_52 = arith.constant 0 : index
    %c0_53 = arith.constant 0 : index
    %101 = vector.load %arg4[%c0_52, %c0_53] : memref<6x1xf32, #tpu.memory_space<vmem>>, vector<6x1xf32>
    %102 = vector.broadcast %101 : vector<6x1xf32> to vector<6x256xf32>
    %103 = arith.addf %100, %102 : vector<6x256xf32>
    %c1_54 = arith.constant 1 : index
    %c0_55 = arith.constant 0 : index
    %c0_56 = arith.constant 0 : index
    %104 = vector.load %arg6[%c1_54, %c0_55, %c0_56] : memref<2x6x256xf32, #tpu.memory_space<vmem>>, vector<1x6x256xf32>
    %105 = vector.shape_cast %104 : vector<1x6x256xf32> to vector<6x256xf32>
    %106 = vector.shape_cast %103 : vector<6x256xf32> to vector<1x6x256xf32>
    tpu.vector_store %arg6[%c1_54, %c0_55, %c0_56], %106 {strides = array<i32>} : memref<2x6x256xf32, #tpu.memory_space<vmem>>, vector<1x6x256xf32>,
    %107 = vector.extract_strided_slice %103 {offsets = [0, 0], sizes = [4, 256], strides = [1, 1]} : vector<6x256xf32> to vector<4x256xf32>
    %108 = vector.extract_strided_slice %103 {offsets = [4, 0], sizes = [2, 256], strides = [1, 1]} : vector<6x256xf32> to vector<2x256xf32>
    %c1_57 = arith.constant 1 : index
    %c0_58 = arith.constant 0 : index
    %c0_59 = arith.constant 0 : index
    %109 = vector.load %arg5[%c1_57, %c0_58, %c0_59] : memref<2x6x256xf32, #tpu.memory_space<vmem>>, vector<1x6x256xf32>
    %110 = vector.shape_cast %109 : vector<1x6x256xf32> to vector<6x256xf32>
    %111 = vector.extract_strided_slice %110 {offsets = [0, 0], sizes = [4, 256], strides = [1, 1]} : vector<6x256xf32> to vector<4x256xf32>
    %112 = vector.extract_strided_slice %110 {offsets = [4, 0], sizes = [2, 256], strides = [1, 1]} : vector<6x256xf32> to vector<2x256xf32>
    %cst_60 = arith.constant 5.000000e-01 : f32
    %113 = vector.broadcast %cst_60 : f32 to vector<4x256xf32>
    %114 = arith.mulf %113, %107 : vector<4x256xf32>
    %115 = math.tanh %114 : vector<4x256xf32>
    %cst_61 = arith.constant 1.000000e+00 : f32
    %116 = vector.broadcast %cst_61 : f32 to vector<4x256xf32>
    %117 = arith.addf %115, %116 : vector<4x256xf32>
    %cst_62 = arith.constant 5.000000e-01 : f32
    %118 = vector.broadcast %cst_62 : f32 to vector<4x256xf32>
    %119 = arith.mulf %118, %117 : vector<4x256xf32>
    %cst_63 = arith.constant 9.99999974E-5 : f32
    %cst_64 = arith.constant 0.999899983 : f32
    %120 = vector.broadcast %cst_63 : f32 to vector<4x256xf32>
    %121 = arith.maximumf %120, %119 : vector<4x256xf32>
    %122 = vector.broadcast %cst_64 : f32 to vector<4x256xf32>
    %123 = arith.minimumf %122, %121 : vector<4x256xf32>
    %cst_65 = arith.constant 1.000000e+00 : f32
    %124 = vector.broadcast %cst_65 : f32 to vector<4x256xf32>
    %125 = arith.cmpf oge, %111, %124 : vector<4x256xf32>
    %cst_66 = arith.constant 1.000000e+00 : f32
    %cst_67 = arith.constant 0.000000e+00 : f32
    %126 = vector.broadcast %cst_66 : f32 to vector<4x256xf32>
    %127 = vector.broadcast %cst_67 : f32 to vector<4x256xf32>
    %128 = arith.select %125, %126, %127 : vector<4x256xi1>, vector<4x256xf32>
    %cst_68 = arith.constant 1.000000e+00 : f32
    %129 = vector.broadcast %cst_68 : f32 to vector<4x256xf32>
    %130 = arith.subf %129, %111 : vector<4x256xf32>
    %131 = arith.mulf %130, %130 : vector<4x256xf32>
    %132 = arith.mulf %130, %130 : vector<4x256xf32>
    %133 = arith.mulf %131, %132 : vector<4x256xf32>
    %134 = math.log %123 : vector<4x256xf32>
    %cst_69 = arith.constant 1.000000e+00 : f32
    %135 = vector.broadcast %cst_69 : f32 to vector<4x256xf32>
    %136 = arith.subf %135, %123 : vector<4x256xf32>
    %137 = arith.mulf %136, %136 : vector<4x256xf32>
    %138 = arith.mulf %134, %137 : vector<4x256xf32>
    %139 = arith.mulf %138, %128 : vector<4x256xf32>
    %140 = vector.shape_cast %139 : vector<4x256xf32> to vector<1x4x256xf32>
    %cst_70 = arith.constant dense<0.000000e+00> : vector<1xf32>
    %141 = vector.multi_reduction <add>, %140, %cst_70 [1, 2] : vector<1x4x256xf32> to vector<1xf32>
    %142 = vector.shape_cast %141 : vector<1xf32> to vector<1x1x1xf32>
    %143 = vector.extract %142[0, 0, 0] : f32 from vector<1x1x1xf32>
    %144 = arith.addf %54, %143 : f32
    %cst_71 = arith.constant 1.000000e+00 : f32
    %145 = vector.broadcast %cst_71 : f32 to vector<4x256xf32>
    %146 = arith.subf %145, %123 : vector<4x256xf32>
    %147 = math.log %146 : vector<4x256xf32>
    %148 = arith.mulf %123, %123 : vector<4x256xf32>
    %149 = arith.mulf %147, %148 : vector<4x256xf32>
    %150 = arith.mulf %149, %133 : vector<4x256xf32>
    %cst_72 = arith.constant 1.000000e+00 : f32
    %151 = vector.broadcast %cst_72 : f32 to vector<4x256xf32>
    %152 = arith.subf %151, %128 : vector<4x256xf32>
    %153 = arith.mulf %150, %152 : vector<4x256xf32>
    %154 = vector.shape_cast %153 : vector<4x256xf32> to vector<1x4x256xf32>
    %cst_73 = arith.constant dense<0.000000e+00> : vector<1xf32>
    %155 = vector.multi_reduction <add>, %154, %cst_73 [1, 2] : vector<1x4x256xf32> to vector<1xf32>
    %156 = vector.shape_cast %155 : vector<1xf32> to vector<1x1x1xf32>
    %157 = vector.extract %156[0, 0, 0] : f32 from vector<1x1x1xf32>
    %158 = arith.addf %68, %157 : f32
    %159 = vector.shape_cast %128 : vector<4x256xf32> to vector<1x4x256xf32>
    %cst_74 = arith.constant dense<0.000000e+00> : vector<1xf32>
    %160 = vector.multi_reduction <add>, %159, %cst_74 [1, 2] : vector<1x4x256xf32> to vector<1xf32>
    %161 = vector.shape_cast %160 : vector<1xf32> to vector<1x1x1xf32>
    %162 = vector.extract %161[0, 0, 0] : f32 from vector<1x1x1xf32>
    %163 = arith.addf %73, %162 : f32
    %cst_75 = arith.constant dense<0xFF800000> : vector<256xf32>
    %164 = vector.multi_reduction <maximumf>, %128, %cst_75 [0] : vector<4x256xf32> to vector<256xf32>
    %165 = vector.shape_cast %164 : vector<256xf32> to vector<1x256xf32>
    %166 = arith.subf %108, %112 : vector<2x256xf32>
    %167 = math.absf %166 : vector<2x256xf32>
    %168 = vector.broadcast %165 : vector<1x256xf32> to vector<2x256xf32>
    %169 = arith.mulf %167, %168 : vector<2x256xf32>
    %170 = vector.shape_cast %169 : vector<2x256xf32> to vector<1x2x256xf32>
    %cst_76 = arith.constant dense<0.000000e+00> : vector<1xf32>
    %171 = vector.multi_reduction <add>, %170, %cst_76 [1, 2] : vector<1x2x256xf32> to vector<1xf32>
    %172 = vector.shape_cast %171 : vector<1xf32> to vector<1x1x1xf32>
    %173 = vector.extract %172[0, 0, 0] : f32 from vector<1x1x1xf32>
    %174 = arith.addf %84, %173 : f32
    %175 = vector.shape_cast %165 : vector<1x256xf32> to vector<1x1x256xf32>
    %cst_77 = arith.constant dense<0.000000e+00> : vector<1xf32>
    %176 = vector.multi_reduction <add>, %175, %cst_77 [1, 2] : vector<1x1x256xf32> to vector<1xf32>
    %177 = vector.shape_cast %176 : vector<1xf32> to vector<1x1x1xf32>
    %178 = vector.extract %177[0, 0, 0] : f32 from vector<1x1x1xf32>
    %179 = arith.addf %89, %178 : f32
    %cst_78 = arith.constant 0.000000e+00 : f32
    %180 = arith.cmpf ogt, %163, %cst_78 : f32
    %181 = arith.addf %144, %158 : f32
    %cst_79 = arith.constant 0.000000e+00 : f32
    %182 = arith.subf %cst_79, %181 : f32
    %cst_80 = arith.constant 1.000000e+00 : f32
    %183 = arith.maximumf %163, %cst_80 : f32
    %184 = arith.divf %182, %183 : f32
    %cst_81 = arith.constant 0.000000e+00 : f32
    %185 = arith.subf %cst_81, %158 : f32
    %186 = arith.select %180, %184, %185 : f32
    %cst_82 = arith.constant 2.000000e+00 : f32
    %187 = arith.mulf %179, %cst_82 : f32
    %cst_83 = arith.constant 9.99999974E-5 : f32
    %188 = arith.addf %187, %cst_83 : f32
    %189 = arith.divf %174, %188 : f32
    %cst_84 = arith.constant 1.000000e-01 : f32
    %190 = arith.mulf %cst_84, %189 : f32
    %191 = arith.addf %186, %190 : f32
    %192 = tpu.iota {dimensions = array<i32: 1>} : vector<1x8xi32>
    %c0_i32 = arith.constant 0 : i32
    %193 = vector.broadcast %c0_i32 : i32 to vector<1x8xi32>
    %194 = arith.cmpi eq, %192, %193 : vector<1x8xi32>
    %cst_85 = arith.constant 0.000000e+00 : f32
    %195 = vector.broadcast %191 : f32 to vector<1x8xf32>
    %196 = vector.broadcast %cst_85 : f32 to vector<1x8xf32>
    %197 = arith.select %194, %195, %196 : vector<1x8xi1>, vector<1x8xf32>
    %c1_i32 = arith.constant 1 : i32
    %198 = vector.broadcast %c1_i32 : i32 to vector<1x8xi32>
    %199 = arith.cmpi eq, %192, %198 : vector<1x8xi32>
    %cst_86 = arith.constant 0.000000e+00 : f32
    %200 = vector.broadcast %186 : f32 to vector<1x8xf32>
    %201 = vector.broadcast %cst_86 : f32 to vector<1x8xf32>
    %202 = arith.select %199, %200, %201 : vector<1x8xi1>, vector<1x8xf32>
    %203 = arith.addf %197, %202 : vector<1x8xf32>
    %c2_i32 = arith.constant 2 : i32
    %204 = vector.broadcast %c2_i32 : i32 to vector<1x8xi32>
    %205 = arith.cmpi eq, %192, %204 : vector<1x8xi32>
    %cst_87 = arith.constant 0.000000e+00 : f32
    %206 = vector.broadcast %189 : f32 to vector<1x8xf32>
    %207 = vector.broadcast %cst_87 : f32 to vector<1x8xf32>
    %208 = arith.select %205, %206, %207 : vector<1x8xi1>, vector<1x8xf32>
    %209 = arith.addf %203, %208 : vector<1x8xf32>
    %c3_i32 = arith.constant 3 : i32
    %210 = vector.broadcast %c3_i32 : i32 to vector<1x8xi32>
    %211 = arith.cmpi eq, %192, %210 : vector<1x8xi32>
    %cst_88 = arith.constant 0.000000e+00 : f32
    %212 = vector.broadcast %163 : f32 to vector<1x8xf32>
    %213 = vector.broadcast %cst_88 : f32 to vector<1x8xf32>
    %214 = arith.select %211, %212, %213 : vector<1x8xi1>, vector<1x8xf32>
    %215 = arith.addf %209, %214 : vector<1x8xf32>
    %c0_89 = arith.constant 0 : index
    %c0_90 = arith.constant 0 : index
    %216 = vector.load %arg7[%c0_89, %c0_90] : memref<1x8xf32, #tpu.memory_space<vmem>>, vector<1x8xf32>
    tpu.vector_store %arg7[%c0_89, %c0_90], %215 {strides = array<i32>} : memref<1x8xf32, #tpu.memory_space<vmem>>, vector<1x8xf32>,
    return
  }
}

</mosaic_0001>

<bundles_post_ra>
// kernel: model_with_loss_forward.1
= control target key start
LH: loop header
LB: loop body
LE: loop exit
PB: predicated region body
PF: predicated region fallthrough
CT: control target
= control target key end

     0   :  { %v949_v3 = vmov 0.0   ;;  %v950_v4 = vmov 0   ;;  %vm76_vm0 = vcmask 1043456   ;;  %vm63_vm1 = vcmask 293888   ;;  %s1243_s0 = inlined_call_operand.vmem [shape: f32[2,36,256], index: 0, kind: input, shape index: {}]   ;;  %s1244_s2 = inlined_call_operand.vmem [shape: f32[32,1], index: 2, kind: input, shape index: {}]   ;;  %s1245_s1 = inlined_call_operand.vmem [shape: f32[32,36], index: 1, kind: input, shape index: {}]   ;;  %s1246_s4 = inlined_call_operand.vmem [shape: f32[6,1], index: 4, kind: input, shape index: {}]   ;;  %s1247_s3 = inlined_call_operand.vmem [shape: f32[6,32], index: 3, kind: input, shape index: {}]   ;;  %s1248_s5 = inlined_call_operand.vmem [shape: f32[2,6,256], index: 5, kind: input, shape index: {}]   ;;  %s1249_s6 = inlined_call_operand.vmem [shape: f32[2,6,256], index: 6, kind: output, shape index: {0}]   ;;  %s1250_s7 = inlined_call_operand.vmem [shape: f32[1,8], index: 7, kind: output, shape index: {1}]  }
   0x1   :  { %v26_v0 = vld [vmem:[%s1243_s0 + $0x8] sm:$0xff]  ;;  %v28_v1 = vld [vmem:[%s1243_s0 + $0x18] sm:$0xff]  ;;  %v25_v2 = vld [vmem:[%s1243_s0] sm:$0xff]  ;;  %147 = vmatprep.mubr.f32.mxu0 %v949_v3  ;;  %919 = vset.pattern.permute.xlu0 %v950_v4  ;;  %vm187_vm2 = vcmask 261120   ;;  %vm393_vm7 = vcmask 1040384   ;;  %vm379_vm8 = vcmask 1041408  }
   0x2   :  { %v860_v5 = vpack.c.bf16 %v28_v1, %v26_v0  ;;  %v27_v6 = vld [vmem:[%s1243_s0 + $0x10] sm:$0xff]  ;;  %v30_v7 = vld [vmem:[%s1243_s0 + $0x28] sm:$0xff]  ;;  %v32_v8 = vld [vmem:[%s1243_s0 + $0x38] sm:$0xff]  ;;  %920 = vset.pattern.permute.xlu1 %v950_v4  ;;  %255 = vmatprep.mubr.f32.mxu1 %v949_v3  ;;  %vm822_vm13 = vcmask 57344  }
   0x3   :  { %v862_v9 = vpack.c.bf16 %v27_v6, %v25_v2  ;;  %v864_v10 = vpack.c.bf16 %v32_v8, %v30_v7  ;;  %v29_v11 = vld [vmem:[%s1243_s0 + $0x20] sm:$0xff]  ;;  %v31_v12 = vld [vmem:[%s1243_s0 + $0x30] sm:$0xff]  ;;  %v34_v16 = vld [vmem:[%s1243_s0 + $0x48] sm:$0xf] }
   0x4   :  { %861 = vmatprep.subr.bf16.mxu0 %v860_v5  ;;  %v866_v13 = vpack.c.bf16 %v31_v12, %v29_v11  ;;  %v39_v14 = vld [vmem:[%s1244_s2] sm:$0xff]  ;;  %v41_v15 = vld [vmem:[%s1244_s2 + $0x10] sm:$0xff]  ;;  %v40_v17 = vld [vmem:[%s1244_s2 + $0x8] sm:$0xff] }
   0x5   :  { %863 = vmatpush1.bf16.msra.mxu0 %v862_v9  ;;  %45 = vperm.xlu0 %919, %v39_v14   ;;  %v42_v18 = vld [vmem:[%s1244_s2 + $0x18] sm:$0xff]  ;;  %v33_v19 = vld [vmem:[%s1243_s0 + $0x40] sm:$0xf]  ;;  %v1049_v21 = vld [vmem:[%s1245_s1 + $0x8] sm:$0xff] }
   0x6   :  { %865 = vmatprep.subr.bf16.mxu0 %v864_v10  ;;  %55 = vperm.xlu1 %920, %v41_v15   ;;  %v1040_v20 = vld [vmem:[%s1245_s1] sm:$0xff]  ;;  %v1057_v22 = vld [vmem:[%s1245_s1 + $0x10] sm:$0xff]  ;;  %v1071_v25 = vld [vmem:[%s1245_s1 + $0x18] sm:$0xff] }
   0x7   :  { %v181_v23 = vld [vmem:[%s1246_s4] sm:$0x3f]  ;;  %v840_v54 = vld [vmem:[%s1243_s0 + $0x58] sm:$0xff]  ;;  %v842_v55 = vld [vmem:[%s1243_s0 + $0x68] sm:$0xff] }
   0x8   :  { %v562_v24 = vld [vmem:[%s1246_s4] sm:$0x3f]  ;;  %v876_v60 = vpack.c.bf16 %v842_v55, %v840_v54  ;;  %v839_v61 = vld [vmem:[%s1243_s0 + $0x50] sm:$0xff]  ;;  %v844_v63 = vld [vmem:[%s1243_s0 + $0x78] sm:$0xff] }
   0x9   :  { %867 = vmatpush1.bf16.msra.mxu0 %v866_v13  ;;  %50 = vperm.xlu0 %919, %v40_v17   ;;  %v841_v62 = vld [vmem:[%s1243_s0 + $0x60] sm:$0xff]  ;;  %v846_v0 = vld [vmem:[%s1243_s0 + $0x88] sm:$0xff]  ;;  %v843_v5 = vld [vmem:[%s1243_s0 + $0x70] sm:$0xff] }
   0xa   :  { %832 = vmatprep.subr.msk.mxu0 %vm76_vm0, %v34_v16  ;;  %60 = vperm.xlu1 %920, %v42_v18   ;;  %v180_v1 = vld [vmem:[%s1247_s3] sm:$0x3f]  ;;  %v878_v2 = vpack.c.bf16 %v841_v62, %v839_v61  ;;  %v880_v4 = vpack.c.bf16 %v846_v0, %v844_v63  ;;  %v848_v8 = vld [vmem:[%s1243_s0 + $0x98] sm:$0xf]  ;;  %v847_v9 = vld [vmem:[%s1243_s0 + $0x90] sm:$0xf] }
   0xb   :  { %v845_v6 = vld [vmem:[%s1243_s0 + $0x80] sm:$0xff]  ;;  %v1132_v11 = vld [vmem:[%s1248_s5 + $0x8] sm:$0x3f]  ;;  %s951_s0 = smov 1.0  }
   0xc   :  { %v882_v7 = vpack.c.bf16 %v845_v6, %v843_v5  ;;  %v1127_v10 = vld [vmem:[%s1248_s5] sm:$0x3f]  ;;  %vm279_vm4 = vcmp.ge.f32.partialorder %v1132_v11, 1.0 }
   0xd   :  { %833 = vmatpush1.msk.msra.mxu0 %vm76_vm0, %v33_v19  ;;  %428 = vperm.xlu0 %919, %v39_v14   ;;  %vm278_vm3 = vcmp.ge.f32.partialorder %v1127_v10, 1.0  ;;  %v1140_v13 = vsel %vm279_vm4, 1.0, %v949_v3 }
   0xe   :  { %834 = vmatmul.mubr.msk.f32.vlgmr.msra.gmra.mrb[0].mxu0 %vm63_vm1, %v1040_v20  ;;  %433 = vperm.xlu1 %920, %v40_v17   ;;  %v1137_v12 = vsel %vm278_vm3, 1.0, %v949_v3  ;;  %v1149_v17 = vld [vmem:[%s1248_s5 + $0x10] sm:$0x3f] }
   0xf   :  { %153 = vmatprep.mubr.f32.mxu0 %v949_v3  ;;  %v340_v14 = vsel %vm76_vm0, %v1137_v12, 0.0  ;;  %vm660_vm5 = vcmp.ge.f32.partialorder %v1149_v17, 1.0 }
  0x10   :  { %v1159_v19 = vsel %vm660_vm5, 1.0, %v949_v3 }
  0x11   :  { %438 = vperm.xlu0 %919, %v41_v15   ;;  %v341_v15 = vsel %vm76_vm0, %v1140_v13, 0.0 }
  0x12   :  { %835 = vmatmul.mubr.msk.f32.gmra.mrb[2].mxu0 %vm63_vm1, %v1049_v21  ;;  %443 = vperm.xlu1 %920, %v42_v18   ;;  %v342_v16 = vadd.f32 %v341_v15, %v340_v14  ;;  %v1154_v18 = vld [vmem:[%s1248_s5 + $0x18] sm:$0x3f] }
  0x13   :  { %159 = vmatprep.mubr.f32.mxu0 %v949_v3  ;;  %vm661_vm6 = vcmp.ge.f32.partialorder %v1154_v18, 1.0 }
  0x15   :  { %184 = vperm.xlu0 %919, %v181_v23  }
  0x16   :  { %836 = vmatmul.mubr.msk.f32.gmra.mrb[4].mxu0 %vm63_vm1, %v1057_v22  ;;  %565 = vperm.xlu1 %920, %v562_v24   ;;  %v353_v24 = vsel %vm76_vm0, %v1137_v12, -inf }
  0x17   :  { %165 = vmatprep.mubr.f32.mxu0 %v949_v3 }
  0x1a   :  { %837 = vmatmul.mubr.msk.f32.gmra.mrb[6].mxu0 %vm63_vm1, %v1071_v25 }
  0x1b   :  { %635 = vmatprep.mubr.f32.mxu0 %v949_v3 }
  0x34   :  { %343 = vadd.xlane.f32.xlu0 %v342_v16 }
  0x84   :  { %v46_v26 = vpop.permute.xlu0 %45 }
  0x85   :  { %v56_v35 = vpop.permute.xlu1 %55 }
  0x88   :  { %v51_v30 = vpop.permute.xlu0 %50 }
  0x89   :  { %v61_v46 = vpop.permute.xlu1 %60 }
  0x8d   :  { %v434_v63 = vpop.permute.xlu1 %433 }
  0xe1   :  { %v149_v27 = vpop.f32.mrb[0].mxu0 }
  0xe2   :  { %v151_v28 = vpop.f32.mrb[1].mxu0  ;;  %v150_v29 = vadd.f32 %v149_v27, %v46_v26 }
  0xe3   :  { %v152_v31 = vadd.f32 %v151_v28, %v46_v26  ;;  %v354_v26 = vrot.slane %v353_v24, 4 }
  0xe4   :  { %v172_v37 = vmax.f32 %v150_v29, 0.0 }
  0xe5   :  { %v155_v32 = vpop.f32.mrb[2].mxu0  ;;  %v173_v39 = vmax.f32 %v152_v31, 0.0  ;;  %v355_v28 = vmax.f32 %v353_v24, %v354_v26 }
  0xe6   :  { %v156_v33 = vadd.f32 %v155_v32, %v51_v30  ;;  %v157_v34 = vpop.f32.mrb[3].mxu0 }
  0xe7   :  { %v158_v36 = vadd.f32 %v157_v34, %v51_v30 }
  0xe8   :  { %v174_v38 = vmax.f32 %v156_v33, 0.0 }
  0xe9   :  { %v175_v40 = vmax.f32 %v158_v36, 0.0  ;;  %v161_v41 = vpop.f32.mrb[4].mxu0 }
  0xea   :  { %v163_v42 = vpop.f32.mrb[5].mxu0  ;;  %v870_v43 = vpack.c.bf16 %v174_v38, %v172_v37  ;;  %v162_v45 = vadd.f32 %v161_v41, %v56_v35 }
  0xeb   :  { %v868_v44 = vpack.c.bf16 %v175_v40, %v173_v39  ;;  %v164_v47 = vadd.f32 %v163_v42, %v56_v35  ;;  %v429_v40 = vpop.permute.xlu0 %428 }
  0xec   :  { %v176_v52 = vmax.f32 %v162_v45, 0.0 }
  0xed   :  { %v167_v48 = vpop.f32.mrb[6].mxu0  ;;  %869 = vmatprep.subr.bf16.mxu1 %v868_v44  ;;  %v177_v56 = vmax.f32 %v164_v47, 0.0 }
  0xee   :  { %v168_v49 = vadd.f32 %v167_v48, %v61_v46  ;;  %v169_v50 = vpop.f32.mrb[7].mxu0  ;;  %871 = vmatpush1.bf16.msra.mxu1 %v870_v43 }
  0xef   :  { %v170_v51 = vadd.f32 %v169_v50, %v61_v46  ;;  %v439_v41 = vpop.permute.xlu0 %438 }
  0xf0   :  { %v178_v53 = vmax.f32 %v168_v49, 0.0 }
  0xf1   :  { %v179_v57 = vmax.f32 %v170_v51, 0.0 }
  0xf2   :  { %v874_v58 = vpack.c.bf16 %v178_v53, %v176_v52 }
  0xf3   :  { %v872_v59 = vpack.c.bf16 %v179_v57, %v177_v56  ;;  %v185_v42 = vpop.permute.xlu0 %184 }
  0xf5   :  { %873 = vmatprep.subr.bf16.mxu1 %v872_v59 }
  0xf6   :  { %875 = vmatpush1.bf16.msra.mxu1 %v874_v58 }
  0xf7   :  { %877 = vmatprep.subr.bf16.mxu1 %v876_v60 }
  0xf9   :  { %838 = vmatmul.mubr.msk.f32.vlgmr.msra.gmra.mrb[0].mxu1 %vm187_vm2, %v180_v1 }
  0xfa   :  { %879 = vmatpush1.bf16.msra.mxu1 %v878_v2  ;;  %528 = vmatprep.mubr.f32.mxu1 %v949_v3 }
  0xfb   :  { %881 = vmatprep.subr.bf16.mxu1 %v880_v4 }
  0xfe   :  { %883 = vmatpush1.bf16.msra.mxu1 %v882_v7 }
  0xff   :  { %849 = vmatprep.subr.msk.mxu1 %vm76_vm0, %v848_v8 }
 0x102   :  { %850 = vmatpush1.msk.msra.mxu1 %vm76_vm0, %v847_v9 }
 0x103   :  { %851 = vmatmul.mubr.msk.f32.vlgmr.msra.gmra.mrb[2].mxu1 %vm63_vm1, %v1040_v20  ;;  %v1162_v20 = vsel %vm661_vm6, 1.0, %v949_v3 }
 0x104   :  { %534 = vmatprep.mubr.f32.mxu1 %v949_v3 }
 0x107   :  { %852 = vmatmul.mubr.msk.f32.gmra.mrb[4].mxu1 %vm63_vm1, %v1049_v21  ;;  %v722_v21 = vsel %vm76_vm0, %v1159_v19, 0.0 }
 0x108   :  { %540 = vmatprep.mubr.f32.mxu1 %v949_v3 }
 0x10b   :  { %853 = vmatmul.mubr.msk.f32.gmra.mrb[6].mxu1 %vm63_vm1, %v1057_v22  ;;  %v723_v22 = vsel %vm76_vm0, %v1162_v20, 0.0 }
 0x10c   :  { %546 = vmatprep.mubr.f32.mxu1 %v949_v3  ;;  %v724_v23 = vadd.f32 %v723_v22, %v722_v21  ;;  %v356_v3 = vrot.slane %v355_v28, 2 }
 0x10e   :  { %725 = vadd.xlane.f32.xlu0 %v724_v23  ;;  %v357_v31 = vmax.f32 %v355_v28, %v356_v3 }
 0x10f   :  { %854 = vmatmul.mubr.msk.f32.gmra.mrb[8].mxu1 %vm63_vm1, %v1071_v25  ;;  %v360_v25 = vsel %vm76_vm0, %v1140_v13, -inf }
 0x110   :  { %v361_v27 = vrot.slane %v360_v25, 4  ;;  %v358_v33 = vrot.slane %v357_v31, 1 }
 0x112   :  { %v362_v29 = vmax.f32 %v360_v25, %v361_v27  ;;  %v359_v35 = vmax.f32 %v357_v31, %v358_v33 }
 0x114   :  { %v363_v30 = vrot.slane %v362_v29, 2  ;;  %v394_v37 = vsel %vm393_vm7, %v359_v35, 0.0 }
 0x116   :  { %v364_v32 = vmax.f32 %v362_v29, %v363_v30  ;;  %v444_v30 = vpop.permute.xlu1 %443 }
 0x118   :  { %v365_v34 = vrot.slane %v364_v32, 1 }
 0x11a   :  { %v366_v36 = vmax.f32 %v364_v32, %v365_v34 }
 0x11c   :  { %v395_v38 = vsel %vm393_vm7, %v366_v36, 0.0 }
 0x11d   :  { %v396_v39 = vadd.f32 %v395_v38, %v394_v37 }
 0x11f   :  { %397 = vadd.xlane.f32.xlu1 %v396_v39 }
 0x1cc   :  { %v257_v43 = vpop.f32.mrb[0].mxu1 }
 0x1cd   :  { %v258_v44 = vadd.f32 %v257_v43, %v185_v42  ;;  %v259_v45 = vpop.f32.mrb[1].mxu1 }
 0x1ce   :  { %v260_v46 = vadd.f32 %v259_v45, %v185_v42 }
 0x1cf   :  { %262 = vst [vmem:[%s1249_s6] sm:$0x3f] %v258_v44  ;;  %v266_v47 = vmul.f32 0.5, %v258_v44  ;;  %v367_v48 = vsub.f32 %v258_v44, %v1127_v10 }
 0x1d0   :  { %263 = vst [vmem:[%s1249_s6 + $0x8] sm:$0x3f] %v260_v46  ;;  %v267_v49 = vmul.f32 0.5, %v260_v46  ;;  %v368_v50 = vsub.f32 %v260_v46, %v1132_v11 }
 0x1d1   :  { %921 = vtanh.f32 %v266_v47  ;;  %v369_v51 = vand.u32 2147483647, %v367_v48  ;;  %v283_v47 = vsub.f32 1.0, %v1132_v11  ;;  %v561_v48 = vld [vmem:[%s1247_s3] sm:$0x3f] }
 0x1d2   :  { %923 = vtanh.f32 %v267_v49  ;;  %v370_v52 = vand.u32 2147483647, %v368_v50 }
 0x1d3   :  { %v371_v53 = vmul.f32 %v369_v51, %v359_v35  ;;  %v285_v51 = vmul.f32 %v283_v47, %v283_v47 }
 0x1d4   :  { %v372_v54 = vmul.f32 %v370_v52, %v366_v36 }
 0x1d5   :  { %v375_v55 = vrot.slane %v371_v53, 4 }
 0x1d6   :  { %v530_v56 = vpop.f32.mrb[2].mxu1  ;;  %v376_v57 = vrot.slane %v372_v54, 4 }
 0x1d7   :  { %v532_v58 = vpop.f32.mrb[3].mxu1  ;;  %v380_v59 = vsel %vm379_vm8, %v375_v55, 0.0  ;;  %v531_v61 = vadd.f32 %v530_v56, %v429_v40 }
 0x1d8   :  { %v381_v60 = vsel %vm379_vm8, %v376_v57, 0.0  ;;  %v533_v0 = vadd.f32 %v532_v58, %v429_v40 }
 0x1d9   :  { %v382_v62 = vadd.f32 %v381_v60, %v380_v59  ;;  %v553_v14 = vmax.f32 %v531_v61, 0.0 }
 0x1da   :  { %v536_v1 = vpop.f32.mrb[4].mxu1  ;;  %v554_v21 = vmax.f32 %v533_v0, 0.0 }
 0x1db   :  { %v922_v2 = vpop.eup %921  ;;  %v537_v4 = vadd.f32 %v536_v1, %v434_v63  ;;  %v538_v5 = vpop.f32.mrb[5].mxu1  ;;  %383 = vadd.xlane.f32.xlu0 %v382_v62  ;;  %v287_v62 = vmul.f32 %v285_v51, %v285_v51 }
 0x1dc   :  { %v924_v6 = vpop.eup %923  ;;  %v270_v7 = vadd.f32 1.0, %v922_v2  ;;  %v539_v8 = vadd.f32 %v538_v5, %v434_v63 }
 0x1dd   :  { %v271_v9 = vadd.f32 1.0, %v924_v6  ;;  %v555_v15 = vmax.f32 %v537_v4, 0.0  ;;  %v323_v4 = vsub.f32 1.0, %v1137_v12 }
 0x1de   :  { %v272_v16 = vmul.f32 0.5, %v270_v7  ;;  %v556_v22 = vmax.f32 %v539_v8, 0.0  ;;  %v542_v23 = vpop.f32.mrb[6].mxu1  ;;  %v324_v7 = vsub.f32 1.0, %v1140_v13 }
 0x1df   :  { %v273_v24 = vmul.f32 0.5, %v271_v9  ;;  %v886_v25 = vpack.c.bf16 %v555_v15, %v553_v14  ;;  %v544_v26 = vpop.f32.mrb[7].mxu1  ;;  %v543_v3 = vadd.f32 %v542_v23, %v439_v41 }
 0x1e0   :  { %v274_v27 = vmax.f32 %v272_v16, 0.0001  ;;  %v884_v28 = vpack.c.bf16 %v556_v22, %v554_v21  ;;  %v545_v32 = vadd.f32 %v544_v26, %v439_v41  ;;  %v282_v41 = vsub.f32 1.0, %v1127_v10 }
 0x1e1   :  { %v275_v29 = vmax.f32 %v273_v24, 0.0001  ;;  %v557_v39 = vmax.f32 %v543_v3, 0.0 }
 0x1e2   :  { %v276_v31 = vmin.f32 %v274_v27, 0.9999  ;;  %v548_v33 = vpop.f32.mrb[8].mxu1  ;;  %885 = vmatprep.subr.bf16.mxu0 %v884_v28  ;;  %v558_v43 = vmax.f32 %v545_v32, 0.0  ;;  %v284_v49 = vmul.f32 %v282_v41, %v282_v41 }
 0x1e3   :  { %v277_v34 = vmin.f32 %v275_v29, 0.9999  ;;  %v549_v35 = vadd.f32 %v548_v33, %v444_v30  ;;  %v550_v36 = vpop.f32.mrb[9].mxu1  ;;  %887 = vmatpush1.bf16.msra.mxu0 %v886_v25  ;;  %v344_v25 = vpop.xlane.xlu0 %343 }
 0x1e4   :  { %v551_v37 = vadd.f32 %v550_v36, %v444_v30  ;;  %925 = vlog2.f32 %v276_v31  ;;  %v292_v38 = vsub.f32 1.0, %v276_v31  ;;  %v286_v59 = vmul.f32 %v284_v49, %v284_v49 }
 0x1e5   :  { %v559_v40 = vmax.f32 %v549_v35, 0.0  ;;  %927 = vlog2.f32 %v277_v34  ;;  %v293_v42 = vsub.f32 1.0, %v277_v34  ;;  %v317_v60 = vmul.f32 %v276_v31, %v276_v31 }
 0x1e6   :  { %v560_v44 = vmax.f32 %v551_v37, 0.0  ;;  %929 = vlog2.f32 %v292_v38  ;;  %v294_v54 = vmul.f32 %v292_v38, %v292_v38  ;;  %v318_v0 = vmul.f32 %v277_v34, %v277_v34 }
 0x1e7   :  { %v890_v45 = vpack.c.bf16 %v559_v40, %v557_v39  ;;  %931 = vlog2.f32 %v293_v42  ;;  %v295_v57 = vmul.f32 %v293_v42, %v293_v42  ;;  %v1198_v26 = vpop.xlane.xlu0 %725  ;;  %v345_v27 = vrot.slane %v344_v25, 4 }
 0x1e8   :  { %v888_v46 = vpack.c.bf16 %v560_v44, %v558_v43 }
 0x1e9   :  { %v346_v3 = vadd.f32 %v345_v27, %v344_v25 }
 0x1ea   :  { %889 = vmatprep.subr.bf16.mxu0 %v888_v46 }
 0x1eb   :  { %891 = vmatpush1.bf16.msra.mxu0 %v890_v45  ;;  %v347_v34 = vrot.slane %v346_v3, 2 }
 0x1ed   :  { %v348_v40 = vadd.f32 %v347_v34, %v346_v3 }
 0x1ee   :  { %v926_v50 = vpop.eup %925  ;;  %855 = vmatmul.mubr.msk.f32.vlgmr.msra.gmra.mrb[8].mxu0 %vm187_vm2, %v561_v48 }
 0x1ef   :  { %v928_v52 = vpop.eup %927  ;;  %v289_v53 = vmul.f32 0.6931472, %v926_v50  ;;  %v349_v41 = vrot.slane %v348_v40, 1 }
 0x1f0   :  { %v930_v55 = vpop.eup %929  ;;  %v291_v56 = vmul.f32 0.6931472, %v928_v52 }
 0x1f1   :  { %v932_v10 = vpop.eup %931  ;;  %v296_v58 = vmul.f32 %v294_v54, %v289_v53  ;;  %v314_v11 = vmul.f32 0.6931472, %v930_v55  ;;  %v350_v51 = vadd.f32 %v349_v41, %v348_v40  ;;  %v735_v54 = vsel %vm76_vm0, %v1159_v19, -inf }
 0x1f2   :  { %v297_v61 = vmul.f32 %v295_v57, %v291_v56  ;;  %v316_v63 = vmul.f32 0.6931472, %v932_v10  ;;  %v742_v55 = vsel %vm76_vm0, %v1162_v20, -inf  ;;  %v736_v56 = vrot.slane %v735_v54, 4 }
 0x1f3   :  { %v298_v1 = vmul.f32 %v296_v58, %v1137_v12  ;;  %v319_v2 = vmul.f32 %v317_v60, %v314_v11  ;;  %v743_v57 = vrot.slane %v742_v55, 4  ;;  %v665_v40 = vsub.f32 1.0, %v1154_v18 }
 0x1f4   :  { %v299_v5 = vmul.f32 %v297_v61, %v1140_v13  ;;  %v320_v6 = vmul.f32 %v318_v0, %v316_v63  ;;  %v566_v13 = vpop.permute.xlu1 %565  ;;  %v737_v10 = vmax.f32 %v735_v54, %v736_v56 }
 0x1f5   :  { %v300_v8 = vsel %vm76_vm0, %v298_v1, 0.0  ;;  %v321_v9 = vmul.f32 %v319_v2, %v286_v59  ;;  %v744_v58 = vmax.f32 %v742_v55, %v743_v57 }
 0x1f6   :  { %v301_v14 = vsel %vm76_vm0, %v299_v5, 0.0  ;;  %v322_v15 = vmul.f32 %v320_v6, %v287_v62  ;;  %v738_v59 = vrot.slane %v737_v10, 2 }
 0x1f7   :  { %v302_v16 = vadd.f32 %v301_v14, %v300_v8  ;;  %v325_v21 = vmul.f32 %v323_v4, %v321_v9  ;;  %v745_v11 = vrot.slane %v744_v58, 2 }
 0x1f8   :  { %v326_v22 = vmul.f32 %v324_v7, %v322_v15  ;;  %v1200_v30 = vpop.xlane.xlu1 %397  ;;  %v739_v60 = vmax.f32 %v737_v10, %v738_v59 }
 0x1f9   :  { %303 = vadd.xlane.f32.xlu0 %v302_v16  ;;  %v327_v23 = vsel %vm76_vm0, %v325_v21, 0.0  ;;  %v746_v61 = vmax.f32 %v744_v58, %v745_v11  ;;  %v705_v58 = vsub.f32 1.0, %v1159_v19 }
 0x1fa   :  { %v328_v24 = vsel %vm76_vm0, %v326_v22, 0.0  ;;  %v740_v62 = vrot.slane %v739_v60, 1 }
 0x1fb   :  { %v329_v12 = vadd.f32 %v328_v24, %v327_v23  ;;  %v747_v0 = vrot.slane %v746_v61, 1 }
 0x1fc   :  { %v741_v7 = vmax.f32 %v739_v60, %v740_v62  ;;  %v706_v60 = vsub.f32 1.0, %v1162_v20 }
 0x1fd   :  { %330 = vadd.xlane.f32.xlu1 %v329_v12  ;;  %v748_v14 = vmax.f32 %v746_v61, %v747_v0 }
 0x268   :  { %v384_v28 = vpop.xlane.xlu0 %383 }
 0x269   :  { %v385_v29 = vrot.slane %v384_v28, 4 }
 0x26b   :  { %v386_v32 = vadd.f32 %v385_v29, %v384_v28 }
 0x26d   :  { %v387_v37 = vrot.slane %v386_v32, 2 }
 0x26f   :  { %v388_v46 = vadd.f32 %v387_v37, %v386_v32 }
 0x271   :  { %v389_v50 = vrot.slane %v388_v46, 1 }
 0x273   :  { %v390_v53 = vadd.f32 %v389_v50, %v388_v46 }
 0x286   :  { %v304_v31 = vpop.xlane.xlu0 %303 }
 0x287   :  { %v305_v33 = vrot.slane %v304_v31, 4 }
 0x289   :  { %v306_v35 = vadd.f32 %v305_v33, %v304_v31 }
 0x28a   :  { %v331_v36 = vpop.xlane.xlu1 %330 }
 0x28b   :  { %v307_v38 = vrot.slane %v306_v35, 2  ;;  %v332_v39 = vrot.slane %v331_v36, 4 }
 0x28d   :  { %v333_v42 = vadd.f32 %v332_v39, %v331_v36  ;;  %v308_v43 = vadd.f32 %v307_v38, %v306_v35  ;;  %v664_v39 = vsub.f32 1.0, %v1149_v17 }
 0x28f   :  { %v334_v44 = vrot.slane %v333_v42, 2  ;;  %v309_v45 = vrot.slane %v308_v43, 1 }
 0x291   :  { %v310_v47 = vadd.f32 %v309_v45, %v308_v43  ;;  %v335_v48 = vadd.f32 %v334_v44, %v333_v42  ;;  %v666_v42 = vmul.f32 %v664_v39, %v664_v39  ;;  %v667_v44 = vmul.f32 %v665_v40, %v665_v40 }
 0x293   :  { %892 = vpush %v310_v47  ;;  %v336_v49 = vrot.slane %v335_v48, 1  ;;  %v669_v56 = vmul.f32 %v667_v44, %v667_v44 }
 0x295   :  { %v337_v52 = vadd.f32 %v336_v49, %v335_v48 }
 0x297   :  { %894 = vpush %v337_v52  ;;  %v668_v52 = vmul.f32 %v666_v42, %v666_v42 }
 0x298   :  { %896 = vpush %v350_v51 }
 0x299   :  { %898 = vpush %v390_v53 }
 0x2c1   :  { %v637_v63 = vpop.f32.mrb[8].mxu0 }
 0x2c2   :  { %v638_v1 = vadd.f32 %v637_v63, %v566_v13  ;;  %v639_v2 = vpop.f32.mrb[9].mxu0 }
 0x2c3   :  { %v640_v4 = vadd.f32 %v639_v2, %v566_v13  ;;  %v775_v2 = vsel %vm393_vm7, %v748_v14, 0.0 }
 0x2c4   :  { %856 = vst [vmem:[%s1249_s6 + $0x10] sm:$0x3f] %v638_v1  ;;  %v648_v5 = vmul.f32 0.5, %v638_v1  ;;  %v749_v6 = vsub.f32 %v638_v1, %v1149_v17  ;;  %v774_v1 = vsel %vm393_vm7, %v741_v7, 0.0 }
 0x2c5   :  { %857 = vst [vmem:[%s1249_s6 + $0x18] sm:$0x3f] %v640_v4  ;;  %v649_v8 = vmul.f32 0.5, %v640_v4  ;;  %v750_v9 = vsub.f32 %v640_v4, %v1154_v18  ;;  %s893_s6 = spop %892 }
 0x2c6   :  { %933 = vtanh.f32 %v648_v5  ;;  %v751_v15 = vand.u32 2147483647, %v749_v6 }
 0x2c7   :  { %935 = vtanh.f32 %v649_v8  ;;  %v752_v16 = vand.u32 2147483647, %v750_v9  ;;  %v776_v9 = vadd.f32 %v775_v2, %v774_v1 }
 0x2c8   :  { %v753_v21 = vmul.f32 %v751_v15, %v741_v7  ;;  %s895_s26 = spop %894 }
 0x2c9   :  { %v754_v22 = vmul.f32 %v752_v16, %v748_v14  ;;  %s897_s27 = spop %896 }
 0x2ca   :  { %v757_v23 = vrot.slane %v753_v21, 4  ;;  %s1232_s28 = spop %898 }
 0x2cb   :  { %v758_v24 = vrot.slane %v754_v22, 4 }
 0x2cc   :  { %v761_v12 = vsel %vm379_vm8, %v757_v23, 0.0  ;;  %v727_v23 = vrot.slane %v1198_v26, 4 }
 0x2cd   :  { %v762_v25 = vsel %vm379_vm8, %v758_v24, 0.0 }
 0x2ce   :  { %v763_v13 = vadd.f32 %v762_v25, %v761_v12  ;;  %v728_v24 = vadd.f32 %v727_v23, %v1198_v26 }
 0x2d0   :  { %v934_v27 = vpop.eup %933 }
 0x2d1   :  { %v936_v28 = vpop.eup %935  ;;  %v652_v29 = vadd.f32 1.0, %v934_v27 }
 0x2d2   :  { %v653_v3 = vadd.f32 1.0, %v936_v28  ;;  %v729_v28 = vrot.slane %v728_v24, 2 }
 0x2d3   :  { %v654_v31 = vmul.f32 0.5, %v652_v29 }
 0x2d4   :  { %v655_v32 = vmul.f32 0.5, %v653_v3 }
 0x2d5   :  { %v656_v33 = vmax.f32 %v654_v31, 0.0001 }
 0x2d6   :  { %v657_v34 = vmax.f32 %v655_v32, 0.0001 }
 0x2d7   :  { %v658_v35 = vmin.f32 %v656_v33, 0.9999 }
 0x2d8   :  { %v659_v36 = vmin.f32 %v657_v34, 0.9999 }
 0x2d9   :  { %937 = vlog2.f32 %v658_v35  ;;  %v674_v37 = vsub.f32 1.0, %v658_v35  ;;  %v699_v54 = vmul.f32 %v658_v35, %v658_v35 }
 0x2da   :  { %939 = vlog2.f32 %v659_v36  ;;  %v675_v38 = vsub.f32 1.0, %v659_v36  ;;  %v700_v17 = vmul.f32 %v659_v36, %v659_v36  ;;  %v730_v36 = vadd.f32 %v729_v28, %v728_v24 }
 0x2db   :  { %941 = vlog2.f32 %v674_v37  ;;  %v676_v41 = vmul.f32 %v674_v37, %v674_v37 }
 0x2dc   :  { %943 = vlog2.f32 %v675_v38  ;;  %v677_v49 = vmul.f32 %v675_v38, %v675_v38 }
 0x2e3   :  { %v938_v43 = vpop.eup %937 }
 0x2e4   :  { %v940_v45 = vpop.eup %939  ;;  %v671_v46 = vmul.f32 0.6931472, %v938_v43 }
 0x2e5   :  { %v942_v47 = vpop.eup %941  ;;  %v673_v48 = vmul.f32 0.6931472, %v940_v45  ;;  %v731_v45 = vrot.slane %v730_v36, 1 }
 0x2e6   :  { %v944_v50 = vpop.eup %943  ;;  %v678_v51 = vmul.f32 %v676_v41, %v671_v46  ;;  %v696_v53 = vmul.f32 0.6931472, %v942_v47 }
 0x2e7   :  { %v679_v55 = vmul.f32 %v677_v49, %v673_v48  ;;  %v698_v57 = vmul.f32 0.6931472, %v944_v50  ;;  %v732_v49 = vadd.f32 %v731_v45, %v730_v36 }
 0x2e8   :  { %v680_v18 = vmul.f32 %v678_v51, %v1159_v19  ;;  %v701_v10 = vmul.f32 %v699_v54, %v696_v53  ;;  %v399_v19 = vrot.slane %v1200_v30, 4 }
 0x2e9   :  { %v681_v59 = vmul.f32 %v679_v55, %v1162_v20  ;;  %v702_v11 = vmul.f32 %v700_v17, %v698_v57  ;;  %v805_v17 = vlaneseq }
 0x2ea   :  { %v682_v61 = vsel %vm76_vm0, %v680_v18, 0.0  ;;  %v703_v62 = vmul.f32 %v701_v10, %v668_v52  ;;  %v400_v16 = vadd.f32 %v399_v19, %v1200_v30 }
 0x2eb   :  { %v683_v63 = vsel %vm76_vm0, %v681_v59, 0.0  ;;  %v704_v0 = vmul.f32 %v702_v11, %v669_v56  ;;  %v806_v18 = vand.u32 127, %v805_v17 }
 0x2ec   :  { %v684_v4 = vadd.f32 %v683_v63, %v682_v61  ;;  %v707_v5 = vmul.f32 %v705_v58, %v703_v62  ;;  %v401_v21 = vrot.slane %v400_v16, 2 }
 0x2ed   :  { %v708_v6 = vmul.f32 %v706_v60, %v704_v0  ;;  %vm807_vm9 = vcmp.eq.s32.totalorder %v806_v18, 0  ;;  %vm810_vm10 = vcmp.eq.s32.totalorder %v806_v18, 1  ;;  %vm814_vm11 = vcmp.eq.s32.totalorder %v806_v18, 2 }
 0x2ee   :  { %685 = vadd.xlane.f32.xlu0 %v684_v4  ;;  %v709_v8 = vsel %vm76_vm0, %v707_v5, 0.0  ;;  %v402_v7 = vadd.f32 %v401_v21, %v400_v16  ;;  %vm818_vm12 = vcmp.eq.s32.totalorder %v806_v18, 3 }
 0x2ef   :  { %v710_v20 = vsel %vm76_vm0, %v708_v6, 0.0 }
 0x2f0   :  { %v711_v15 = vadd.f32 %v710_v20, %v709_v8  ;;  %v403_v14 = vrot.slane %v402_v7, 1 }
 0x2f2   :  { %712 = vadd.xlane.f32.xlu1 %v711_v15  ;;  %777 = vadd.xlane.f32.xlu0 %v776_v9  ;;  %v404_v22 = vadd.f32 %v403_v14, %v402_v7 }
 0x2f4   :  { %900 = vpush %v404_v22 }
 0x2f6   :  { %764 = vadd.xlane.f32.xlu1 %v763_v13 }
 0x325   :  { %s901_s29 = spop %900 }
 0x37b   :  { %v686_v12 = vpop.xlane.xlu0 %685 }
 0x37c   :  { %v687_v25 = vrot.slane %v686_v12, 4 }
 0x37e   :  { %v688_v27 = vadd.f32 %v687_v25, %v686_v12 }
 0x37f   :  { %v713_v29 = vpop.xlane.xlu1 %712  ;;  %v778_v3 = vpop.xlane.xlu0 %777 }
 0x380   :  { %v689_v31 = vrot.slane %v688_v27, 2  ;;  %v714_v30 = vrot.slane %v713_v29, 4  ;;  %v779_v32 = vrot.slane %v778_v3, 4 }
 0x382   :  { %v715_v33 = vadd.f32 %v714_v30, %v713_v29  ;;  %v780_v34 = vadd.f32 %v779_v32, %v778_v3  ;;  %v690_v13 = vadd.f32 %v689_v31, %v688_v27 }
 0x383   :  { %v765_v35 = vpop.xlane.xlu1 %764 }
 0x384   :  { %v716_v37 = vrot.slane %v715_v33, 2  ;;  %v781_v38 = vrot.slane %v780_v34, 2  ;;  %v766_v39 = vrot.slane %v765_v35, 4  ;;  %v691_v40 = vrot.slane %v690_v13, 1 }
 0x386   :  { %v767_v42 = vadd.f32 %v766_v39, %v765_v35  ;;  %v692_v26 = vadd.f32 %v691_v40, %v690_v13  ;;  %v717_v43 = vadd.f32 %v716_v37, %v715_v33  ;;  %v782_v44 = vadd.f32 %v781_v38, %v780_v34 }
 0x388   :  { %v768_v46 = vrot.slane %v767_v42, 2  ;;  %902 = vpush %v692_v26  ;;  %v718_v41 = vrot.slane %v717_v43, 1  ;;  %v783_v50 = vrot.slane %v782_v44, 1 }
 0x38a   :  { %v769_v47 = vadd.f32 %v768_v46, %v767_v42  ;;  %v719_v48 = vadd.f32 %v718_v41, %v717_v43  ;;  %v784_v53 = vadd.f32 %v783_v50, %v782_v44 }
 0x38c   :  { %904 = vpush %v719_v48  ;;  %v770_v51 = vrot.slane %v769_v47, 1 }
 0x38d   :  { %906 = vpush %v732_v49 }
 0x38e   :  { %v771_v52 = vadd.f32 %v770_v51, %v769_v47 }
 0x390   :  { %908 = vpush %v771_v52 }
 0x391   :  { %910 = vpush %v784_v53 }
 0x3b9   :  { %s903_s30 = spop %902 }
 0x3ba   :  { %s694_s2 = sadd.f32 %s903_s30, %s893_s6 }
 0x3bd   :  { %s905_s8 = spop %904 }
 0x3be   :  { %s721_s9 = sadd.f32 %s905_s8, %s895_s26  ;;  %s907_s10 = spop %906 }
 0x3bf   :  { %s1234_s11 = sadd.f32 %s907_s10, %s897_s27 }
 0x3c0   :  { %s788_s12 = sadd.f32 %s721_s9, %s694_s2 }
 0x3c1   :  { %s790_s13 = smax.f32 %s951_s0, %s1234_s11  ;;  %s909_s14 = spop %908  ;;  %v819_v61 = vstv %s1234_s11 }
 0x3c2   :  { %v791_v54 = vstv %s790_s13  ;;  %s911_s15 = spop %910  ;;  %s789_s17 = ssub.f32 0.0, %s788_s12  ;;  %v820_v1 = vsel %vm818_vm12, %v819_v61, 0.0 }
 0x3c3   :  { %945 = vrcp.f32 %v791_v54  ;;  %s786_s16 = sadd.f32 %s911_s15, %s901_s29  ;;  %p787_p0 = scmp.gt.f32.partialorder %s1234_s11, 0.0 }
 0x3c4   :  { %s795_s5 = ssub.f32 0.0, %s721_s9 }
 0x3c5   :  { %s797_s1 = smul.f32 2.0, %s786_s16  ;;  %s773_s20 = sadd.f32 %s909_s14, %s1232_s28 }
 0x3c7   :  { %s798_s4 = sadd.f32 0.0001, %s797_s1 }
 0x3c9   :  { %v799_v55 = vstv %s798_s4 }
 0x3ca   :  { %947 = vrcp.f32 %v799_v55 }
 0x3cd   :  { %v946_v56 = vpop.eup %945 }
 0x3ce   :  { %912 = vpush %v946_v56 }
 0x3d4   :  { %v948_v57 = vpop.eup %947 }
 0x3d5   :  { %914 = vpush %v948_v57 }
 0x3ff   :  { %s913_s18 = spop %912 }
 0x400   :  { %s794_s19 = smul.f32 %s913_s18, %s789_s17 }
 0x402   :  { %s1252_s19 = smov (!%p787_p0, %s794_s19), %s795_s5 }
 0x403   :  { %v811_v10 = vstv %s1252_s19 }
 0x404   :  { %v812_v60 = vsel %vm810_vm10, %v811_v10, 0.0 }
 0x406   :  { %s915_s21 = spop %914 }
 0x407   :  { %s802_s22 = smul.f32 %s915_s21, %s773_s20 }
 0x409   :  { %s803_s3 = smul.f32 0.1, %s802_s22  ;;  %v815_v59 = vstv %s802_s22 }
 0x40a   :  { %v816_v63 = vsel %vm814_vm11, %v815_v59, 0.0 }
 0x40b   :  { %s804_s23 = sadd.f32 %s803_s3, %s1252_s19 }
 0x40d   :  { %v808_v58 = vstv %s804_s23 }
 0x40e   :  { %v809_v11 = vsel %vm807_vm9, %v808_v58, 0.0 }
 0x40f   :  { %v813_v62 = vadd.f32 %v812_v60, %v809_v11 }
 0x411   :  { %v817_v0 = vadd.f32 %v816_v63, %v813_v62 }
 0x413   :  { %v821_v2 = vadd.f32 %v820_v1, %v817_v0 }
 0x415   :  { %823 = vst.msk [vmem:[%s1250_s7] sm:$0x1] %vm822_vm13, %v821_v2 }

</bundles_post_ra>
